<compile_context>
chip_gen: v6e
topology: v6e:2x2x1
jax: 0.10.0
libtpu: 0.0.40
codegen_flags: <defaults>
</compile_context>

<pallas_src>
import functools

import jax
import jax.numpy as jnp
import numpy as np
from jax import lax
from jax.experimental import pallas as pl
from jax.experimental.pallas import tpu as pltpu


def _vmem_spec():
    return pl.BlockSpec(memory_space=pltpu.MemorySpace.VMEM)


_COMPILER_PARAMS = pltpu.CompilerParams(vmem_limit_bytes=64 * 1024 * 1024)


# ----------------------------------------------------------------------------
# Fused layer kernel
# ----------------------------------------------------------------------------
def _convt_fused_kernel(x_ref, w_ref, b_ref, *rest, K, final):
    """ConvTranspose2d(stride=2, pad=0) + bias + (BN+ReLU | Tanh).

    x_ref:   (N, Hin, Win, Cin)
    w_ref:   (Cin, K*K*Cout)   columns tap-major: block t = kh*K + kw
    b_ref:   (1, Cout)
    g_ref/be_ref (non-final only): (1, Cout)
    out_ref: (4*N, Hh, Wh, Cout) parity-split accumulator:
             out[(ph*2+pw)*N + n, j, i, c] maps to y[n, 2j+ph, 2i+pw, c]
    """
    if final:
        (out_ref,) = rest
        g_ref = be_ref = None
    else:
        g_ref, be_ref, out_ref = rest

    N, Hin, Win, Cin = x_ref.shape
    Cout = b_ref.shape[-1]
    Hh, Wh = Hin + 1, Win + 1
    Hout, Wout = 2 * (Hin - 1) + K, 2 * (Win - 1) + K

    # 1. Initialize the accumulator (the VMEM-resident output) with the bias:
    #    replaces both the zero-fill pass and the trailing bias-add pass.
    out_ref[...] = jnp.broadcast_to(b_ref[...], out_ref.shape)

    # 2. One MXU matmul for all K*K taps (lane dim = K*K*Cout).
    x2d = x_ref[...].reshape(N * Hin * Win, Cin)
    contrib = jnp.dot(x2d, w_ref[...], preferred_element_type=jnp.float32)
    contrib = contrib.reshape(N, Hin, Win, K * K * Cout)

    # 3. Scatter each tap's slab into its stride-2 parity plane (VMEM adds).
    for kh in range(K):
        ph, oh = kh % 2, kh // 2
        for kw in range(K):
            pw, ow = kw % 2, kw // 2
            t = kh * K + kw
            slab = contrib[:, :, :, t * Cout:(t + 1) * Cout]
            base = (ph * 2 + pw) * N
            cur = out_ref[base:base + N, oh:oh + Hin, ow:ow + Win, :]
            out_ref[base:base + N, oh:oh + Hin, ow:ow + Win, :] = cur + slab

    # 4. Fused epilogue.
    if final:
        out_ref[...] = jnp.tanh(out_ref[...])
        return

    # BatchNorm2d with training-mode batch statistics, eps=1e-5.  Stats are
    # computed in one pass (sum & sum-of-squares) over the VALID region only
    # (cells that survive the crop); padded cells are normalized too but are
    # discarded by the wrapper's crop.
    rH = [min(Hh, (Hout - 1 - ph) // 2 + 1) for ph in (0, 1)]
    rW = [min(Wh, (Wout - 1 - pw) // 2 + 1) for pw in (0, 1)]
    s = jnp.zeros((1, 1, 1, Cout), jnp.float32)
    ss = jnp.zeros((1, 1, 1, Cout), jnp.float32)
    for ph in range(2):
        for pw in range(2):
            base = (ph * 2 + pw) * N
            v = out_ref[base:base + N, :rH[ph], :rW[pw], :]
            s = s + jnp.sum(v, axis=(0, 1, 2), keepdims=True)
            ss = ss + jnp.sum(v * v, axis=(0, 1, 2), keepdims=True)
    inv_cnt = 1.0 / float(N * Hout * Wout)
    mean = s * inv_cnt
    var = ss * inv_cnt - mean * mean
    scale = g_ref[...].reshape(1, 1, 1, Cout) * lax.rsqrt(var + 1e-5)
    shift = be_ref[...].reshape(1, 1, 1, Cout) - mean * scale
    out_ref[...] = jnp.maximum(out_ref[...] * scale + shift, 0.0)


# ----------------------------------------------------------------------------
# Wrapper: one fused pallas_call per generator block
# ----------------------------------------------------------------------------
def gen_block(x, w, b, gamma=None, beta=None, *, final=False):
    """PyTorch make_gen_block(...) forward: ConvT(stride=2) + (BN+ReLU | Tanh)."""
    N, Hin, Win, Cin = x.shape
    K = w.shape[0]
    Cout = w.shape[-1]
    Hh, Wh = Hin + 1, Win + 1
    Hout, Wout = 2 * (Hin - 1) + K, 2 * (Win - 1) + K

    # Pack weights so a single matmul covers all K*K taps (tap-major columns).
    w2d = jnp.transpose(w, (2, 0, 1, 3)).reshape(Cin, K * K * Cout)

    args = [x, w2d, b.reshape(1, Cout)]
    if not final:
        args += [gamma.reshape(1, Cout), beta.reshape(1, Cout)]

    acc = pl.pallas_call(
        functools.partial(_convt_fused_kernel, K=K, final=final),
        out_shape=jax.ShapeDtypeStruct((4 * N, Hh, Wh, Cout), jnp.float32),
        in_specs=[_vmem_spec()] * len(args),
        out_specs=_vmem_spec(),
        compiler_params=_COMPILER_PARAMS,
    )(*args)

    # Stride-2 parity interleave + crop back to dense NHWC (layout-only glue).
    # TODO(synk): fold this interleave into the kernel's store (lane-dense /
    # strided output) to remove the remaining HBM round trip per layer.
    acc = acc.reshape(2, 2, N, Hh, Wh, Cout)
    y = acc.transpose(2, 3, 0, 4, 1, 5).reshape(N, 2 * Hh, 2 * Wh, Cout)
    return y[:, :Hout, :Wout, :]


# ----------------------------------------------------------------------------
# Generator parameters + forward
# ----------------------------------------------------------------------------
def init_generator_params(key, z_dim, im_chan, hidden_dim):
    chans = [z_dim, hidden_dim * 8, hidden_dim * 4, hidden_dim * 2, hidden_dim, im_chan]
    ksizes = [3, 3, 3, 3, 4]
    params = []
    for i in range(5):
        key, wk, bk = jax.random.split(key, 3)
        K, cin, cout = ksizes[i], chans[i], chans[i + 1]
        w = 0.02 * jax.random.normal(wk, (K, K, cin, cout), jnp.float32)
        b = 0.02 * jax.random.normal(bk, (cout,), jnp.float32)
        final = (i == 4)
        gamma = None if final else jnp.ones((cout,), jnp.float32)
        beta = None if final else jnp.zeros((cout,), jnp.float32)
        params.append(dict(w=w, b=b, gamma=gamma, beta=beta, K=K, final=final))
    return params


def generator_forward(noise, params, z_dim):
    # noise: (N, z_dim)  ->  x: (N, 1, 1, z_dim)   [NCHW (N, z, 1, 1) in PyTorch]
    N = noise.shape[0]
    x = noise.reshape(N, 1, 1, z_dim)
    for p in params:
        x = gen_block(x, p["w"], p["b"], p["gamma"], p["beta"], final=p["final"])
    return x  # (N, 64, 64, im_chan) in NHWC  (PyTorch would return NCHW)


# ----------------------------------------------------------------------------
# Pure-JAX reference (for correctness check)
# ----------------------------------------------------------------------------
def ref_forward(noise, params, z_dim):
    N = noise.shape[0]
    x = noise.reshape(N, 1, 1, z_dim)
    for p in params:
        K = p["K"]
        wf = p["w"][::-1, ::-1, :, :]
        y = lax.conv_general_dilated(
            x, wf, window_strides=(1, 1),
            padding=[(K - 1, K - 1), (K - 1, K - 1)],
            lhs_dilation=(2, 2),
            dimension_numbers=("NHWC", "HWIO", "NHWC"),
        ) + p["b"]
        if p["final"]:
            x = jnp.tanh(y)
        else:
            mean = y.mean(axis=(0, 1, 2), keepdims=True)
            var = jnp.square(y - mean).mean(axis=(0, 1, 2), keepdims=True)
            x = jnp.maximum((y - mean) / jnp.sqrt(var + 1e-5) * p["gamma"] + p["beta"], 0.0)
    return x


if __name__ == "__main__":
    z_dim, im_chan, hidden_dim, batch = 8, 3, 8, 2

    key = jax.random.PRNGKey(0)
    key, nkey = jax.random.split(key)
    params = init_generator_params(key, z_dim, im_chan, hidden_dim)
    noise = jax.random.normal(nkey, (batch, z_dim), jnp.float32)  # get_noise(...)

    out = generator_forward(noise, params, z_dim)
    out = jax.block_until_ready(out)
    assert out.shape == (batch, 64, 64, im_chan), out.shape

    ref = jax.block_until_ready(ref_forward(noise, params, z_dim))
    err = float(np.max(np.abs(np.asarray(out) - np.asarray(ref))))
    assert np.allclose(np.asarray(out), np.asarray(ref), atol=2e-2, rtol=2e-2), err

    print("KERNEL_OK")
</pallas_src>

<mosaic_0001>
module attributes {stable_mosaic.version = 11 : i64} {
  func.func @_convt_fused_kernel(%arg0: memref<2x1x1x8xf32, #tpu.memory_space<vmem>>, %arg1: memref<8x576xf32, #tpu.memory_space<vmem>>, %arg2: memref<1x64xf32, #tpu.memory_space<vmem>>, %arg3: memref<1x64xf32, #tpu.memory_space<vmem>>, %arg4: memref<1x64xf32, #tpu.memory_space<vmem>>, %arg5: memref<8x2x2x64xf32, #tpu.memory_space<vmem>>) attributes {dimension_semantics = [], scalar_prefetch = 0 : i64, scratch_operands = 0 : i64, tpu.core_type = #tpu.core_type<tc>} {
    %c0 = arith.constant 0 : index
    %c0_0 = arith.constant 0 : index
    %0 = vector.load %arg2[%c0, %c0_0] : memref<1x64xf32, #tpu.memory_space<vmem>>, vector<1x64xf32>
    %1 = vector.shape_cast %0 : vector<1x64xf32> to vector<1x1x1x64xf32>
    %2 = vector.broadcast %1 : vector<1x1x1x64xf32> to vector<8x2x2x64xf32>
    %c0_1 = arith.constant 0 : index
    %c0_2 = arith.constant 0 : index
    %c0_3 = arith.constant 0 : index
    %c0_4 = arith.constant 0 : index
    %3 = vector.load %arg5[%c0_1, %c0_2, %c0_3, %c0_4] : memref<8x2x2x64xf32, #tpu.memory_space<vmem>>, vector<8x2x2x64xf32>
    tpu.vector_store %arg5[%c0_1, %c0_2, %c0_3, %c0_4], %2 {strides = array<i32>} : memref<8x2x2x64xf32, #tpu.memory_space<vmem>>, vector<8x2x2x64xf32>,
    %c0_5 = arith.constant 0 : index
    %c0_6 = arith.constant 0 : index
    %c0_7 = arith.constant 0 : index
    %c0_8 = arith.constant 0 : index
    %4 = vector.load %arg0[%c0_5, %c0_6, %c0_7, %c0_8] : memref<2x1x1x8xf32, #tpu.memory_space<vmem>>, vector<2x1x1x8xf32>
    %5 = vector.shape_cast %4 : vector<2x1x1x8xf32> to vector<2x8xf32>
    %c0_9 = arith.constant 0 : index
    %c0_10 = arith.constant 0 : index
    %6 = vector.load %arg1[%c0_9, %c0_10] : memref<8x576xf32, #tpu.memory_space<vmem>>, vector<8x576xf32>
    %cst = arith.constant dense<0.000000e+00> : vector<2x576xf32>
    %7 = tpu.matmul %5, %6, %cst {dimension_numbers = #tpu.dot_dimension_numbers<[1], [0], [0], [1], [0, 0, 1, 1], [], []>} : vector<2x8xf32>, vector<8x576xf32>, vector<2x576xf32> -> vector<2x576xf32>
    %8 = vector.shape_cast %7 : vector<2x576xf32> to vector<2x1x1x576xf32>
    %9 = vector.extract_strided_slice %8 {offsets = [0, 0, 0, 0], sizes = [2, 1, 1, 64], strides = [1, 1, 1, 1]} : vector<2x1x1x576xf32> to vector<2x1x1x64xf32>
    %c0_11 = arith.constant 0 : index
    %c0_12 = arith.constant 0 : index
    %c0_13 = arith.constant 0 : index
    %c0_14 = arith.constant 0 : index
    %10 = vector.load %arg5[%c0_11, %c0_12, %c0_13, %c0_14] : memref<8x2x2x64xf32, #tpu.memory_space<vmem>>, vector<2x1x1x64xf32>
    %11 = arith.addf %10, %9 : vector<2x1x1x64xf32>
    %c0_15 = arith.constant 0 : index
    %c0_16 = arith.constant 0 : index
    %c0_17 = arith.constant 0 : index
    %c0_18 = arith.constant 0 : index
    %12 = vector.load %arg5[%c0_15, %c0_16, %c0_17, %c0_18] : memref<8x2x2x64xf32, #tpu.memory_space<vmem>>, vector<2x1x1x64xf32>
    tpu.vector_store %arg5[%c0_15, %c0_16, %c0_17, %c0_18], %11 {strides = array<i32>} : memref<8x2x2x64xf32, #tpu.memory_space<vmem>>, vector<2x1x1x64xf32>,
    %13 = vector.extract_strided_slice %8 {offsets = [0, 0, 0, 64], sizes = [2, 1, 1, 64], strides = [1, 1, 1, 1]} : vector<2x1x1x576xf32> to vector<2x1x1x64xf32>
    %c2 = arith.constant 2 : index
    %c0_19 = arith.constant 0 : index
    %c0_20 = arith.constant 0 : index
    %c0_21 = arith.constant 0 : index
    %14 = vector.load %arg5[%c2, %c0_19, %c0_20, %c0_21] : memref<8x2x2x64xf32, #tpu.memory_space<vmem>>, vector<2x1x1x64xf32>
    %15 = arith.addf %14, %13 : vector<2x1x1x64xf32>
    %c2_22 = arith.constant 2 : index
    %c0_23 = arith.constant 0 : index
    %c0_24 = arith.constant 0 : index
    %c0_25 = arith.constant 0 : index
    %16 = vector.load %arg5[%c2_22, %c0_23, %c0_24, %c0_25] : memref<8x2x2x64xf32, #tpu.memory_space<vmem>>, vector<2x1x1x64xf32>
    tpu.vector_store %arg5[%c2_22, %c0_23, %c0_24, %c0_25], %15 {strides = array<i32>} : memref<8x2x2x64xf32, #tpu.memory_space<vmem>>, vector<2x1x1x64xf32>,
    %17 = vector.extract_strided_slice %8 {offsets = [0, 0, 0, 128], sizes = [2, 1, 1, 64], strides = [1, 1, 1, 1]} : vector<2x1x1x576xf32> to vector<2x1x1x64xf32>
    %c0_26 = arith.constant 0 : index
    %c0_27 = arith.constant 0 : index
    %c1 = arith.constant 1 : index
    %c0_28 = arith.constant 0 : index
    %18 = vector.load %arg5[%c0_26, %c0_27, %c1, %c0_28] : memref<8x2x2x64xf32, #tpu.memory_space<vmem>>, vector<2x1x1x64xf32>
    %19 = arith.addf %18, %17 : vector<2x1x1x64xf32>
    %c0_29 = arith.constant 0 : index
    %c0_30 = arith.constant 0 : index
    %c1_31 = arith.constant 1 : index
    %c0_32 = arith.constant 0 : index
    %20 = vector.load %arg5[%c0_29, %c0_30, %c1_31, %c0_32] : memref<8x2x2x64xf32, #tpu.memory_space<vmem>>, vector<2x1x1x64xf32>
    tpu.vector_store %arg5[%c0_29, %c0_30, %c1_31, %c0_32], %19 {strides = array<i32>} : memref<8x2x2x64xf32, #tpu.memory_space<vmem>>, vector<2x1x1x64xf32>,
    %21 = vector.extract_strided_slice %8 {offsets = [0, 0, 0, 192], sizes = [2, 1, 1, 64], strides = [1, 1, 1, 1]} : vector<2x1x1x576xf32> to vector<2x1x1x64xf32>
    %c4 = arith.constant 4 : index
    %c0_33 = arith.constant 0 : index
    %c0_34 = arith.constant 0 : index
    %c0_35 = arith.constant 0 : index
    %22 = vector.load %arg5[%c4, %c0_33, %c0_34, %c0_35] : memref<8x2x2x64xf32, #tpu.memory_space<vmem>>, vector<2x1x1x64xf32>
    %23 = arith.addf %22, %21 : vector<2x1x1x64xf32>
    %c4_36 = arith.constant 4 : index
    %c0_37 = arith.constant 0 : index
    %c0_38 = arith.constant 0 : index
    %c0_39 = arith.constant 0 : index
    %24 = vector.load %arg5[%c4_36, %c0_37, %c0_38, %c0_39] : memref<8x2x2x64xf32, #tpu.memory_space<vmem>>, vector<2x1x1x64xf32>
    tpu.vector_store %arg5[%c4_36, %c0_37, %c0_38, %c0_39], %23 {strides = array<i32>} : memref<8x2x2x64xf32, #tpu.memory_space<vmem>>, vector<2x1x1x64xf32>,
    %25 = vector.extract_strided_slice %8 {offsets = [0, 0, 0, 256], sizes = [2, 1, 1, 64], strides = [1, 1, 1, 1]} : vector<2x1x1x576xf32> to vector<2x1x1x64xf32>
    %c6 = arith.constant 6 : index
    %c0_40 = arith.constant 0 : index
    %c0_41 = arith.constant 0 : index
    %c0_42 = arith.constant 0 : index
    %26 = vector.load %arg5[%c6, %c0_40, %c0_41, %c0_42] : memref<8x2x2x64xf32, #tpu.memory_space<vmem>>, vector<2x1x1x64xf32>
    %27 = arith.addf %26, %25 : vector<2x1x1x64xf32>
    %c6_43 = arith.constant 6 : index
    %c0_44 = arith.constant 0 : index
    %c0_45 = arith.constant 0 : index
    %c0_46 = arith.constant 0 : index
    %28 = vector.load %arg5[%c6_43, %c0_44, %c0_45, %c0_46] : memref<8x2x2x64xf32, #tpu.memory_space<vmem>>, vector<2x1x1x64xf32>
    tpu.vector_store %arg5[%c6_43, %c0_44, %c0_45, %c0_46], %27 {strides = array<i32>} : memref<8x2x2x64xf32, #tpu.memory_space<vmem>>, vector<2x1x1x64xf32>,
    %29 = vector.extract_strided_slice %8 {offsets = [0, 0, 0, 320], sizes = [2, 1, 1, 64], strides = [1, 1, 1, 1]} : vector<2x1x1x576xf32> to vector<2x1x1x64xf32>
    %c4_47 = arith.constant 4 : index
    %c0_48 = arith.constant 0 : index
    %c1_49 = arith.constant 1 : index
    %c0_50 = arith.constant 0 : index
    %30 = vector.load %arg5[%c4_47, %c0_48, %c1_49, %c0_50] : memref<8x2x2x64xf32, #tpu.memory_space<vmem>>, vector<2x1x1x64xf32>
    %31 = arith.addf %30, %29 : vector<2x1x1x64xf32>
    %c4_51 = arith.constant 4 : index
    %c0_52 = arith.constant 0 : index
    %c1_53 = arith.constant 1 : index
    %c0_54 = arith.constant 0 : index
    %32 = vector.load %arg5[%c4_51, %c0_52, %c1_53, %c0_54] : memref<8x2x2x64xf32, #tpu.memory_space<vmem>>, vector<2x1x1x64xf32>
    tpu.vector_store %arg5[%c4_51, %c0_52, %c1_53, %c0_54], %31 {strides = array<i32>} : memref<8x2x2x64xf32, #tpu.memory_space<vmem>>, vector<2x1x1x64xf32>,
    %33 = vector.extract_strided_slice %8 {offsets = [0, 0, 0, 384], sizes = [2, 1, 1, 64], strides = [1, 1, 1, 1]} : vector<2x1x1x576xf32> to vector<2x1x1x64xf32>
    %c0_55 = arith.constant 0 : index
    %c1_56 = arith.constant 1 : index
    %c0_57 = arith.constant 0 : index
    %c0_58 = arith.constant 0 : index
    %34 = vector.load %arg5[%c0_55, %c1_56, %c0_57, %c0_58] : memref<8x2x2x64xf32, #tpu.memory_space<vmem>>, vector<2x1x1x64xf32>
    %35 = arith.addf %34, %33 : vector<2x1x1x64xf32>
    %c0_59 = arith.constant 0 : index
    %c1_60 = arith.constant 1 : index
    %c0_61 = arith.constant 0 : index
    %c0_62 = arith.constant 0 : index
    %36 = vector.load %arg5[%c0_59, %c1_60, %c0_61, %c0_62] : memref<8x2x2x64xf32, #tpu.memory_space<vmem>>, vector<2x1x1x64xf32>
    tpu.vector_store %arg5[%c0_59, %c1_60, %c0_61, %c0_62], %35 {strides = array<i32>} : memref<8x2x2x64xf32, #tpu.memory_space<vmem>>, vector<2x1x1x64xf32>,
    %37 = vector.extract_strided_slice %8 {offsets = [0, 0, 0, 448], sizes = [2, 1, 1, 64], strides = [1, 1, 1, 1]} : vector<2x1x1x576xf32> to vector<2x1x1x64xf32>
    %c2_63 = arith.constant 2 : index
    %c1_64 = arith.constant 1 : index
    %c0_65 = arith.constant 0 : index
    %c0_66 = arith.constant 0 : index
    %38 = vector.load %arg5[%c2_63, %c1_64, %c0_65, %c0_66] : memref<8x2x2x64xf32, #tpu.memory_space<vmem>>, vector<2x1x1x64xf32>
    %39 = arith.addf %38, %37 : vector<2x1x1x64xf32>
    %c2_67 = arith.constant 2 : index
    %c1_68 = arith.constant 1 : index
    %c0_69 = arith.constant 0 : index
    %c0_70 = arith.constant 0 : index
    %40 = vector.load %arg5[%c2_67, %c1_68, %c0_69, %c0_70] : memref<8x2x2x64xf32, #tpu.memory_space<vmem>>, vector<2x1x1x64xf32>
    tpu.vector_store %arg5[%c2_67, %c1_68, %c0_69, %c0_70], %39 {strides = array<i32>} : memref<8x2x2x64xf32, #tpu.memory_space<vmem>>, vector<2x1x1x64xf32>,
    %41 = vector.extract_strided_slice %8 {offsets = [0, 0, 0, 512], sizes = [2, 1, 1, 64], strides = [1, 1, 1, 1]} : vector<2x1x1x576xf32> to vector<2x1x1x64xf32>
    %c0_71 = arith.constant 0 : index
    %c1_72 = arith.constant 1 : index
    %c1_73 = arith.constant 1 : index
    %c0_74 = arith.constant 0 : index
    %42 = vector.load %arg5[%c0_71, %c1_72, %c1_73, %c0_74] : memref<8x2x2x64xf32, #tpu.memory_space<vmem>>, vector<2x1x1x64xf32>
    %43 = arith.addf %42, %41 : vector<2x1x1x64xf32>
    %c0_75 = arith.constant 0 : index
    %c1_76 = arith.constant 1 : index
    %c1_77 = arith.constant 1 : index
    %c0_78 = arith.constant 0 : index
    %44 = vector.load %arg5[%c0_75, %c1_76, %c1_77, %c0_78] : memref<8x2x2x64xf32, #tpu.memory_space<vmem>>, vector<2x1x1x64xf32>
    tpu.vector_store %arg5[%c0_75, %c1_76, %c1_77, %c0_78], %43 {strides = array<i32>} : memref<8x2x2x64xf32, #tpu.memory_space<vmem>>, vector<2x1x1x64xf32>,
    %cst_79 = arith.constant 0.000000e+00 : f32
    %45 = vector.broadcast %cst_79 : f32 to vector<1x1x1x64xf32>
    %cst_80 = arith.constant 0.000000e+00 : f32
    %46 = vector.broadcast %cst_80 : f32 to vector<1x1x1x64xf32>
    %c0_81 = arith.constant 0 : index
    %c0_82 = arith.constant 0 : index
    %c0_83 = arith.constant 0 : index
    %c0_84 = arith.constant 0 : index
    %47 = vector.load %arg5[%c0_81, %c0_82, %c0_83, %c0_84] : memref<8x2x2x64xf32, #tpu.memory_space<vmem>>, vector<2x2x2x64xf32>
    %cst_85 = arith.constant dense<0.000000e+00> : vector<64xf32>
    %48 = vector.multi_reduction <add>, %47, %cst_85 [0, 1, 2] : vector<2x2x2x64xf32> to vector<64xf32>
    %49 = vector.shape_cast %48 : vector<64xf32> to vector<1x1x1x64xf32>
    %50 = arith.addf %45, %49 : vector<1x1x1x64xf32>
    %51 = arith.mulf %47, %47 : vector<2x2x2x64xf32>
    %cst_86 = arith.constant dense<0.000000e+00> : vector<64xf32>
    %52 = vector.multi_reduction <add>, %51, %cst_86 [0, 1, 2] : vector<2x2x2x64xf32> to vector<64xf32>
    %53 = vector.shape_cast %52 : vector<64xf32> to vector<1x1x1x64xf32>
    %54 = arith.addf %46, %53 : vector<1x1x1x64xf32>
    %c2_87 = arith.constant 2 : index
    %c0_88 = arith.constant 0 : index
    %c0_89 = arith.constant 0 : index
    %c0_90 = arith.constant 0 : index
    %55 = vector.load %arg5[%c2_87, %c0_88, %c0_89, %c0_90] : memref<8x2x2x64xf32, #tpu.memory_space<vmem>>, vector<2x2x1x64xf32>
    %cst_91 = arith.constant dense<0.000000e+00> : vector<64xf32>
    %56 = vector.multi_reduction <add>, %55, %cst_91 [0, 1, 2] : vector<2x2x1x64xf32> to vector<64xf32>
    %57 = vector.shape_cast %56 : vector<64xf32> to vector<1x1x1x64xf32>
    %58 = arith.addf %50, %57 : vector<1x1x1x64xf32>
    %59 = arith.mulf %55, %55 : vector<2x2x1x64xf32>
    %cst_92 = arith.constant dense<0.000000e+00> : vector<64xf32>
    %60 = vector.multi_reduction <add>, %59, %cst_92 [0, 1, 2] : vector<2x2x1x64xf32> to vector<64xf32>
    %61 = vector.shape_cast %60 : vector<64xf32> to vector<1x1x1x64xf32>
    %62 = arith.addf %54, %61 : vector<1x1x1x64xf32>
    %c4_93 = arith.constant 4 : index
    %c0_94 = arith.constant 0 : index
    %c0_95 = arith.constant 0 : index
    %c0_96 = arith.constant 0 : index
    %63 = vector.load %arg5[%c4_93, %c0_94, %c0_95, %c0_96] : memref<8x2x2x64xf32, #tpu.memory_space<vmem>>, vector<2x1x2x64xf32>
    %cst_97 = arith.constant dense<0.000000e+00> : vector<64xf32>
    %64 = vector.multi_reduction <add>, %63, %cst_97 [0, 1, 2] : vector<2x1x2x64xf32> to vector<64xf32>
    %65 = vector.shape_cast %64 : vector<64xf32> to vector<1x1x1x64xf32>
    %66 = arith.addf %58, %65 : vector<1x1x1x64xf32>
    %67 = arith.mulf %63, %63 : vector<2x1x2x64xf32>
    %cst_98 = arith.constant dense<0.000000e+00> : vector<64xf32>
    %68 = vector.multi_reduction <add>, %67, %cst_98 [0, 1, 2] : vector<2x1x2x64xf32> to vector<64xf32>
    %69 = vector.shape_cast %68 : vector<64xf32> to vector<1x1x1x64xf32>
    %70 = arith.addf %62, %69 : vector<1x1x1x64xf32>
    %c6_99 = arith.constant 6 : index
    %c0_100 = arith.constant 0 : index
    %c0_101 = arith.constant 0 : index
    %c0_102 = arith.constant 0 : index
    %71 = vector.load %arg5[%c6_99, %c0_100, %c0_101, %c0_102] : memref<8x2x2x64xf32, #tpu.memory_space<vmem>>, vector<2x1x1x64xf32>
    %cst_103 = arith.constant dense<0.000000e+00> : vector<64xf32>
    %72 = vector.multi_reduction <add>, %71, %cst_103 [0, 1, 2] : vector<2x1x1x64xf32> to vector<64xf32>
    %73 = vector.shape_cast %72 : vector<64xf32> to vector<1x1x1x64xf32>
    %74 = arith.addf %66, %73 : vector<1x1x1x64xf32>
    %75 = arith.mulf %71, %71 : vector<2x1x1x64xf32>
    %cst_104 = arith.constant dense<0.000000e+00> : vector<64xf32>
    %76 = vector.multi_reduction <add>, %75, %cst_104 [0, 1, 2] : vector<2x1x1x64xf32> to vector<64xf32>
    %77 = vector.shape_cast %76 : vector<64xf32> to vector<1x1x1x64xf32>
    %78 = arith.addf %70, %77 : vector<1x1x1x64xf32>
    %cst_105 = arith.constant 0.055555556 : f32
    %79 = vector.broadcast %cst_105 : f32 to vector<1x1x1x64xf32>
    %80 = arith.mulf %74, %79 : vector<1x1x1x64xf32>
    %cst_106 = arith.constant 0.055555556 : f32
    %81 = vector.broadcast %cst_106 : f32 to vector<1x1x1x64xf32>
    %82 = arith.mulf %78, %81 : vector<1x1x1x64xf32>
    %83 = arith.mulf %80, %80 : vector<1x1x1x64xf32>
    %84 = arith.subf %82, %83 : vector<1x1x1x64xf32>
    %c0_107 = arith.constant 0 : index
    %c0_108 = arith.constant 0 : index
    %85 = vector.load %arg3[%c0_107, %c0_108] : memref<1x64xf32, #tpu.memory_space<vmem>>, vector<1x64xf32>
    %86 = vector.shape_cast %85 : vector<1x64xf32> to vector<1x1x1x64xf32>
    %cst_109 = arith.constant 9.99999974E-6 : f32
    %87 = vector.broadcast %cst_109 : f32 to vector<1x1x1x64xf32>
    %88 = arith.addf %84, %87 : vector<1x1x1x64xf32>
    %89 = math.rsqrt %88 : vector<1x1x1x64xf32>
    %90 = arith.mulf %86, %89 : vector<1x1x1x64xf32>
    %c0_110 = arith.constant 0 : index
    %c0_111 = arith.constant 0 : index
    %91 = vector.load %arg4[%c0_110, %c0_111] : memref<1x64xf32, #tpu.memory_space<vmem>>, vector<1x64xf32>
    %92 = vector.shape_cast %91 : vector<1x64xf32> to vector<1x1x1x64xf32>
    %93 = arith.mulf %80, %90 : vector<1x1x1x64xf32>
    %94 = arith.subf %92, %93 : vector<1x1x1x64xf32>
    %c0_112 = arith.constant 0 : index
    %c0_113 = arith.constant 0 : index
    %c0_114 = arith.constant 0 : index
    %c0_115 = arith.constant 0 : index
    %95 = vector.load %arg5[%c0_112, %c0_113, %c0_114, %c0_115] : memref<8x2x2x64xf32, #tpu.memory_space<vmem>>, vector<8x2x2x64xf32>
    %96 = vector.broadcast %90 : vector<1x1x1x64xf32> to vector<8x2x2x64xf32>
    %97 = arith.mulf %95, %96 : vector<8x2x2x64xf32>
    %98 = vector.broadcast %94 : vector<1x1x1x64xf32> to vector<8x2x2x64xf32>
    %99 = arith.addf %97, %98 : vector<8x2x2x64xf32>
    %cst_116 = arith.constant 0.000000e+00 : f32
    %100 = vector.broadcast %cst_116 : f32 to vector<8x2x2x64xf32>
    %101 = arith.maximumf %99, %100 : vector<8x2x2x64xf32>
    %c0_117 = arith.constant 0 : index
    %c0_118 = arith.constant 0 : index
    %c0_119 = arith.constant 0 : index
    %c0_120 = arith.constant 0 : index
    %102 = vector.load %arg5[%c0_117, %c0_118, %c0_119, %c0_120] : memref<8x2x2x64xf32, #tpu.memory_space<vmem>>, vector<8x2x2x64xf32>
    tpu.vector_store %arg5[%c0_117, %c0_118, %c0_119, %c0_120], %101 {strides = array<i32>} : memref<8x2x2x64xf32, #tpu.memory_space<vmem>>, vector<8x2x2x64xf32>,
    return
  }
}

</mosaic_0001>

<bundles_post_ra>
// kernel: tpu_custom_call.1
= control target key start
LH: loop header
LB: loop body
LE: loop exit
PB: predicated region body
PF: predicated region fallthrough
CT: control target
= control target key end

     0   :  { %10 = vsyncpa [#allocation3], 0  ;;  %s1011_s0 = inlined_call_operand.hbm [shape: f32[2,1,1,8], index: 0, kind: input, shape index: {}]   ;;  %s1012_s1 = inlined_call_operand.hbm [shape: f32[8,576], index: 1, kind: input, shape index: {}]   ;;  %s1013_s2 = inlined_call_operand.vmem [shape: f32[1,64], index: 2, kind: input, shape index: {}]   ;;  %s1014_s3 = inlined_call_operand.vmem [shape: f32[1,64], index: 3, kind: input, shape index: {}]   ;;  %s1015_s4 = inlined_call_operand.vmem [shape: f32[1,64], index: 4, kind: input, shape index: {}]   ;;  %s1016_s5 = inlined_call_operand.hbm [shape: f32[8,2,2,64], index: 5, kind: output, shape index: {}]  }
   0x1   :  { %11 = vsyncpa [#allocation6], 0 }
   0x2   :  { %12 = vsyncpa [#allocation4], 0  ;;  %s832_s18 = smov [#allocation2]  }
   0x3   :  { %s18_s19 = sshll.u32 %s832_s18, 4  ;;  %s19_s19 = int_to_ptr.vmem [resolvable:$true] %s18_s19 }
   0x4   :  { %s774_s20 = scalar_lea.vmem %s19_s19, 32  ;;  %p779_p1 = scmp.lt.s32.totalorder %s19_s19, %s19_s19 }
   0x5   :  { %p775_p0 = scmp.ne.s32.totalorder %s19_s19, %s774_s20  ;;  %p780_p2 = scmp.lt.s32.totalorder %s774_s20, %s774_s20 }
   0x7   :  { %p781_p3 = por %p780_p2, %p779_p1 }
   0x9   :  { %p782_p4 = pnand %p781_p3, %p775_p0 }
   0xb   :  { %785 = shalt.err (!%p782_p4)
}
   0xc   :  { %s833_s21 = smov 16   ;;  %s834_s22 = smov 1  }
   0xd   :  { %24 = dma.hbm_to_vmem [thread:$0]  %s1011_s0, 32, %s19_s19, [#allocation3], %s833_s21, %s833_s21, %s834_s22  }
   0xe   :  { %s835_s25 = smov [#allocation5]  }
   0xf   :  { %s31_s26 = sshll.u32 %s835_s25, 4  ;;  %s32_s26 = int_to_ptr.vmem [resolvable:$true] %s31_s26 }
  0x10   :  { %s794_s27 = scalar_lea.vmem %s32_s26, 640  ;;  %p799_p6 = scmp.lt.s32.totalorder %s32_s26, %s32_s26 }
  0x11   :  { %p795_p5 = scmp.ne.s32.totalorder %s32_s26, %s794_s27  ;;  %p800_p7 = scmp.lt.s32.totalorder %s794_s27, %s794_s27 }
  0x13   :  { %p801_p8 = por %p800_p7, %p799_p6 }
  0x15   :  { %p802_p9 = pnand %p801_p8, %p795_p5 }
  0x17   :  { %805 = shalt.err (!%p802_p9)
}
  0x18   :  { %34 = dma.hbm_to_vmem [thread:$0]  %s1012_s1, 640, %s32_s26, [#allocation6]  }
  0x19   :  { %826 = dma.done.wait [#allocation3], 32  }
  0x1a   :  { %827 = vsyncadd [#allocation3], 4294967264 }
  0x1b   :  { %828 = dma.done.wait [#allocation6], 640  }
  0x1c   :  { %829 = vsyncadd [#allocation6], 4294966656  ;;  %v84_v0 = vlaneseq  ;;  %v836_v1 = vmov 0.0   ;;  %v837_v2 = vmov 1966171168   ;;  %v74_v6 = vld [vmem:[#allocation5 + $0x8] sm:$0xff] }
  0x1d   :  { %162 = vmatprep.mubr.f32.mxu0 %v836_v1  ;;  %233 = vmatprep.mubr.f32.mxu1 %v836_v1  ;;  %v82_v3 = vunpack.c.l.s4 %v837_v2  ;;  %v73_v7 = vld [vmem:[#allocation5] sm:$0xff]  ;;  %v76_v8 = vld [vmem:[#allocation5 + $0x18] sm:$0xff]  ;;  %v75_v10 = vld [vmem:[#allocation5 + $0x10] sm:$0xff]  ;;  %vm95_vm0 = vcmask 64512   ;;  %vm838_vm1 = vmmov 0   ;;  %vm54_vm2 = vcmask 517120  }
  0x1e   :  { %v879_v5 = vshrl.u32 %v84_v0, 7  ;;  %128 = vmatprep.subr.mxu0 %v74_v6  ;;  %199 = vmatprep.subr.mxu1 %v76_v8  ;;  %v71_v11 = vld [vmem:[#allocation2] sm:$0x1]  ;;  %v72_v12 = vld [vmem:[#allocation2 + $0x1] sm:$0x1]  ;;  %v77_v16 = vld [vmem:[#allocation5 + $0x20] sm:$0xff] }
  0x1f   :  { %v83_v4 = vunpack.c.0.s8 %v82_v3  ;;  %129 = vmatpush1.msra.mxu0 %v73_v7  ;;  %200 = vmatpush1.msra.mxu1 %v75_v10  ;;  %v80_v13 = vcombine.low %v71_v11, %v72_v12  ;;  %v742_v17 = vld [vmem:[%s1013_s2] ss:$0 sm:$0xff]  ;;  %vm377_vm3 = vcmask 516096   ;;  %s839_s2 = smov 64  }
  0x20   :  { %748 = vmatprep.subr.mxu0 %v836_v1  ;;  %56 = vst.msk [vmem:[#allocation7 + $0x2] sm:$0x3] %vm54_vm2, %v742_v17  ;;  %55 = vst.msk [vmem:[#allocation7] sm:$0x3] %vm54_vm2, %v742_v17  ;;  %v493_v32 = vsub.s32 4, %v879_v5  ;;  %v903_v33 = vsub.s32 0, %v879_v5 }
  0x21   :  { %v86_v9 = vsub.s32 %v83_v4, %v879_v5  ;;  %57 = vst.msk [vmem:[#allocation7 + $0x4] sm:$0x3] %vm54_vm2, %v742_v17  ;;  %58 = vst.msk [vmem:[#allocation7 + $0x6] sm:$0x3] %vm54_vm2, %v742_v17  ;;  %v464_v38 = vsub.s32 3, %v879_v5  ;;  %v405_v39 = vsub.s32 1, %v879_v5 }
  0x22   :  { %59 = vst.msk [vmem:[#allocation7 + $0x8] sm:$0x3] %vm54_vm2, %v742_v17  ;;  %60 = vst.msk [vmem:[#allocation7 + $0xa] sm:$0x3] %vm54_vm2, %v742_v17  ;;  %v435_v46 = vsub.s32 2, %v879_v5 }
  0x23   :  { %v87_v14 = vrot.slane %v80_v13, %v86_v9  ;;  %61 = vst.msk [vmem:[#allocation7 + $0xc] sm:$0x3] %vm54_vm2, %v742_v17  ;;  %62 = vst.msk [vmem:[#allocation7 + $0xe] sm:$0x3] %vm54_vm2, %v742_v17 }
  0x24   :  { %63 = vst.msk [vmem:[#allocation7 + $0x10] sm:$0x3] %vm54_vm2, %v742_v17  ;;  %64 = vst.msk [vmem:[#allocation7 + $0x12] sm:$0x3] %vm54_vm2, %v742_v17 }
  0x25   :  { %v94_v15 = vrot.slane %v87_v14, %v86_v9  ;;  %65 = vst.msk [vmem:[#allocation7 + $0x14] sm:$0x3] %vm54_vm2, %v742_v17  ;;  %66 = vst.msk [vmem:[#allocation7 + $0x16] sm:$0x3] %vm54_vm2, %v742_v17 }
  0x26   :  { %67 = vst.msk [vmem:[#allocation7 + $0x18] sm:$0x3] %vm54_vm2, %v742_v17  ;;  %68 = vst.msk [vmem:[#allocation7 + $0x1a] sm:$0x3] %vm54_vm2, %v742_v17 }
  0x27   :  { %743 = vmatmul.mubr.msk.f32.vlgmr.msra.gmra.mxu0 %vm95_vm0, %v94_v15  ;;  %744 = vmatmul.mubr.msk.f32.vlgmr.msra.gmra.mxu1 %vm95_vm0, %v94_v15  ;;  %69 = vst.msk [vmem:[#allocation7 + $0x1c] sm:$0x3] %vm54_vm2, %v742_v17  ;;  %70 = vst.msk [vmem:[#allocation7 + $0x1e] sm:$0x3] %vm54_vm2, %v742_v17  ;;  %v373_v42 = vld [vmem:[#allocation7] sm:$0x1] }
  0x28   :  { %749 = vmatpush3.msra.mxu0 %v77_v16  ;;  %750 = vmatprep.mubr.msk.f32.mxu0 %vm838_vm1, %v836_v1  ;;  %v374_v43 = vld [vmem:[#allocation7 + $0x4] sm:$0x1]  ;;  %v489_v44 = vld [vmem:[#allocation7 + $0x3] sm:$0x1]  ;;  %v490_v45 = vld [vmem:[#allocation7 + $0x7] sm:$0x1] }
  0x29   :  { %v460_v51 = vld [vmem:[#allocation7 + $0x2] sm:$0x1]  ;;  %v461_v52 = vld [vmem:[#allocation7 + $0x6] sm:$0x1]  ;;  %v401_v53 = vld [vmem:[#allocation7 + $0x1] sm:$0x1] }
  0x2a   :  { %v402_v58 = vld [vmem:[#allocation7 + $0x5] sm:$0x1]  ;;  %v381_v13 = vld [vmem:[#allocation7 + $0x8] sm:$0x1]  ;;  %v382_v14 = vld [vmem:[#allocation7 + $0xc] sm:$0x1] }
  0x2b   :  { %751 = vmatmul.mubr.msk.f32.vlgmr.msra.gmra.mxu0 %vm95_vm0, %v94_v15 }
  0x2d   :  { %v431_v2 = vld [vmem:[#allocation7 + $0x18] sm:$0x1] }
  0x2e   :  { %v432_v3 = vld [vmem:[#allocation7 + $0x1c] sm:$0x1] }
  0xe7   :  { %v164_v18 = vpop.f32.mrf.mxu0  ;;  %v235_v19 = vpop.f32.mrf.mxu1 }
  0xe9   :  { %v166_v20 = vpop.f32.mrf.mxu0  ;;  %v237_v21 = vpop.f32.mrf.mxu1 }
  0xea   :  { %v315_v22 = vcombine.low %v164_v18, %v166_v20  ;;  %v316_v23 = vcombine.low %v235_v19, %v237_v21 }
  0xeb   :  { %v306_v24 = vpop.f32.mrf.mxu0 }
  0xec   :  { %v323_v25 = vrot.slane %v315_v22, %v86_v9  ;;  %v330_v26 = vrot.slane %v316_v23, %v86_v9  ;;  %v337_v27 = vrot.slane %v306_v24, %v86_v9 }
  0xed   :  { %v752_v28 = vpop.f32.mrf.mxu0 }
  0xee   :  { %v338_v29 = vcombine.low %v323_v25, %v330_v26  ;;  %v339_v30 = vcombine.high %v323_v25, %v330_v26  ;;  %v340_v31 = vcombine.high %v337_v27, %v337_v27  ;;  %v361_v36 = vrot.slane %v337_v27, %v86_v9  ;;  %v477_v25 = vld [vmem:[#allocation7 + $0xa] sm:$0x1]  ;;  %v478_v26 = vld [vmem:[#allocation7 + $0xe] sm:$0x1] }
  0xf0   :  { %v354_v34 = vrot.slane %v339_v30, %v86_v9  ;;  %v347_v35 = vrot.slane %v338_v29, %v86_v9  ;;  %v368_v37 = vrot.slane %v340_v31, %v86_v9 }
  0xf2   :  { %v369_v40 = vcombine.low %v347_v35, %v361_v36  ;;  %v370_v41 = vcombine.low %v354_v34, %v368_v37 }
  0xf4   :  { %v494_v47 = vrot.slane %v369_v40, %v493_v32  ;;  %v498_v48 = vrot.slane %v370_v41, %v493_v32  ;;  %v386_v49 = vrot.slane %v369_v40, %v903_v33  ;;  %v390_v50 = vrot.slane %v370_v41, %v903_v33 }
  0xf5   :  { %v465_v54 = vrot.slane %v369_v40, %v464_v38  ;;  %v469_v55 = vrot.slane %v370_v41, %v464_v38  ;;  %v406_v56 = vrot.slane %v369_v40, %v405_v39  ;;  %v375_v57 = vadd.f32 %v373_v42, %v369_v40 }
  0xf6   :  { %391 = vrot.lane.b32.xlu0 %v386_v49, %s839_s2  ;;  %393 = vrot.lane.b32.xlu1 %v390_v50, %s839_s2  ;;  %v501_v59 = vadd.f32 %v494_v47, %v489_v44  ;;  %v502_v60 = vadd.f32 %v498_v48, %v490_v45  ;;  %v410_v61 = vrot.slane %v370_v41, %v405_v39 }
  0xf7   :  { %v472_v62 = vadd.f32 %v465_v54, %v460_v51  ;;  %v473_v63 = vadd.f32 %v469_v55, %v461_v52  ;;  %378 = vst.msk [vmem:[#allocation7] sm:$0x1] %vm377_vm3, %v375_v57  ;;  %v413_v0 = vadd.f32 %v406_v56, %v401_v53  ;;  %v376_v1 = vadd.f32 %v374_v43, %v370_v41  ;;  %v447_v51 = vld [vmem:[#allocation7 + $0x11] sm:$0x1] }
  0xf8   :  { %503 = vst.msk [vmem:[#allocation7 + $0x3] sm:$0x1] %vm377_vm3, %v501_v59  ;;  %504 = vst.msk [vmem:[#allocation7 + $0x7] sm:$0x1] %vm377_vm3, %v502_v60  ;;  %v414_v4 = vadd.f32 %v410_v61, %v402_v58  ;;  %v436_v5 = vrot.slane %v369_v40, %v435_v46  ;;  %v440_v6 = vrot.slane %v370_v41, %v435_v46  ;;  %v418_v40 = vld [vmem:[#allocation7 + $0x10] sm:$0x1] }
  0xf9   :  { %474 = vst.msk [vmem:[#allocation7 + $0x2] sm:$0x1] %vm377_vm3, %v472_v62  ;;  %475 = vst.msk [vmem:[#allocation7 + $0x6] sm:$0x1] %vm377_vm3, %v473_v63  ;;  %v419_v41 = vld [vmem:[#allocation7 + $0x14] sm:$0x1] }
  0xfa   :  { %415 = vst.msk [vmem:[#allocation7 + $0x1] sm:$0x1] %vm377_vm3, %v413_v0  ;;  %379 = vst.msk [vmem:[#allocation7 + $0x4] sm:$0x1] %vm377_vm3, %v376_v1  ;;  %479 = vrot.lane.b32.xlu0 %v465_v54, %s839_s2  ;;  %481 = vrot.lane.b32.xlu1 %v469_v55, %s839_s2  ;;  %v443_v7 = vadd.f32 %v436_v5, %v431_v2  ;;  %v444_v8 = vadd.f32 %v440_v6, %v432_v3  ;;  %v448_v55 = vld [vmem:[#allocation7 + $0x15] sm:$0x1] }
  0xfb   :  { %416 = vst.msk [vmem:[#allocation7 + $0x5] sm:$0x1] %vm377_vm3, %v414_v4 }
  0xfc   :  { %445 = vst.msk [vmem:[#allocation7 + $0x18] sm:$0x1] %vm377_vm3, %v443_v7  ;;  %446 = vst.msk [vmem:[#allocation7 + $0x1c] sm:$0x1] %vm377_vm3, %v444_v8 }
  0xfe   :  { %420 = vrot.lane.b32.xlu0 %v406_v56, %s839_s2  ;;  %422 = vrot.lane.b32.xlu1 %v410_v61, %s839_s2 }
 0x100   :  { %v928_v9 = vld [vmem:[#allocation7 + $0x2] sm:$0x3]  ;;  %v944_v27 = vld [vmem:[#allocation7 + $0x6] sm:$0x3] }
 0x101   :  { %v930_v10 = vld [vmem:[#allocation7] sm:$0x3]  ;;  %v524_v11 = vmul.f32 %v928_v9, %v928_v9  ;;  %v510_v15 = vsel %vm54_vm2, %v928_v9, 0.0  ;;  %v526_v38 = vmul.f32 %v944_v27, %v944_v27  ;;  %v514_v48 = vsel %vm54_vm2, %v944_v27, 0.0 }
 0x102   :  { %449 = vrot.lane.b32.xlu0 %v436_v5, %s839_s2  ;;  %451 = vrot.lane.b32.xlu1 %v440_v6, %s839_s2  ;;  %v523_v12 = vmul.f32 %v930_v10, %v930_v10  ;;  %v509_v16 = vsel %vm54_vm2, %v930_v10, 0.0  ;;  %v940_v17 = vld [vmem:[#allocation7 + $0x4] sm:$0x3] }
 0x103   :  { %v528_v20 = vsel %vm54_vm2, %v524_v11, 0.0  ;;  %v511_v24 = vadd.f32 %v510_v15, %v509_v16  ;;  %v525_v28 = vmul.f32 %v940_v17, %v940_v17  ;;  %v601_v30 = vld [vmem:[#allocation7 + $0x18] sm:$0x1]  ;;  %v602_v31 = vld [vmem:[#allocation7 + $0x1c] sm:$0x1]  ;;  %v512_v35 = vsel %vm54_vm2, %v940_v17, 0.0 }
 0x104   :  { %v527_v21 = vsel %vm54_vm2, %v523_v12, 0.0  ;;  %v613_v43 = vmul.f32 %v601_v30, %v601_v30  ;;  %v614_v44 = vmul.f32 %v602_v31, %v602_v31  ;;  %v532_v52 = vsel %vm54_vm2, %v526_v38, 0.0 }
 0x105   :  { %v529_v29 = vadd.f32 %v528_v20, %v527_v21  ;;  %v513_v39 = vadd.f32 %v512_v35, %v511_v24  ;;  %v530_v42 = vsel %vm54_vm2, %v525_v28, 0.0  ;;  %v603_v56 = vsel %vm377_vm3, %v601_v30, 0.0 }
 0x106   :  { %v615_v57 = vsel %vm377_vm3, %v613_v43, 0.0  ;;  %v604_v58 = vsel %vm377_vm3, %v602_v31, 0.0  ;;  %v616_v59 = vsel %vm377_vm3, %v614_v44, 0.0 }
 0x107   :  { %v531_v45 = vadd.f32 %v530_v42, %v529_v29  ;;  %v515_v53 = vadd.f32 %v514_v48, %v513_v39  ;;  %v605_v4 = vadd.f32 %v604_v58, %v603_v56  ;;  %v617_v5 = vadd.f32 %v616_v59, %v615_v57 }
 0x109   :  { %v533_v60 = vadd.f32 %v532_v52, %v531_v45  ;;  %v516_v3 = vrot.slane %v515_v53, 4  ;;  %v606_v21 = vrot.slane %v605_v4, 4 }
 0x10b   :  { %v517_v24 = vadd.f32 %v516_v3, %v515_v53 }
 0x10d   :  { %v518_v38 = vrot.slane %v517_v24, 2 }
 0x168   :  { %v392_v18 = vpop.permute.xlu0 %391  ;;  %v394_v19 = vpop.permute.xlu1 %393 }
 0x169   :  { %v397_v22 = vadd.f32 %v392_v18, %v381_v13  ;;  %v398_v23 = vadd.f32 %v394_v19, %v382_v14  ;;  %v534_v14 = vrot.slane %v533_v60, 4 }
 0x16b   :  { %399 = vst.msk [vmem:[#allocation7 + $0x8] sm:$0x1] %vm377_vm3, %v397_v22  ;;  %400 = vst.msk [vmem:[#allocation7 + $0xc] sm:$0x1] %vm377_vm3, %v398_v23  ;;  %v535_v31 = vadd.f32 %v534_v14, %v533_v60 }
 0x16c   :  { %v480_v32 = vpop.permute.xlu0 %479  ;;  %v482_v34 = vpop.permute.xlu1 %481 }
 0x16d   :  { %v485_v36 = vadd.f32 %v480_v32, %v477_v25  ;;  %v486_v37 = vadd.f32 %v482_v34, %v478_v26  ;;  %v618_v25 = vrot.slane %v617_v5, 4  ;;  %v607_v34 = vadd.f32 %v606_v21, %v605_v4 }
 0x16f   :  { %487 = vst.msk [vmem:[#allocation7 + $0xa] sm:$0x1] %vm377_vm3, %v485_v36  ;;  %488 = vst.msk [vmem:[#allocation7 + $0xe] sm:$0x1] %vm377_vm3, %v486_v37  ;;  %v619_v39 = vadd.f32 %v618_v25, %v617_v5 }
 0x170   :  { %v421_v46 = vpop.permute.xlu0 %420  ;;  %v423_v47 = vpop.permute.xlu1 %422 }
 0x171   :  { %v426_v49 = vadd.f32 %v421_v46, %v418_v40  ;;  %v427_v50 = vadd.f32 %v423_v47, %v419_v41  ;;  %v536_v47 = vrot.slane %v535_v31, 2  ;;  %v620_v57 = vrot.slane %v619_v39, 2 }
 0x172   :  { %v541_v54 = vld [vmem:[#allocation7 + $0x8] sm:$0x1]  ;;  %v543_v61 = vld [vmem:[#allocation7 + $0xc] sm:$0x1] }
 0x173   :  { %428 = vst.msk [vmem:[#allocation7 + $0x10] sm:$0x1] %vm377_vm3, %v426_v49  ;;  %429 = vst.msk [vmem:[#allocation7 + $0x14] sm:$0x1] %vm377_vm3, %v427_v50  ;;  %v559_v0 = vmul.f32 %v541_v54, %v541_v54  ;;  %v545_v8 = vsel %vm377_vm3, %v541_v54, 0.0  ;;  %v561_v11 = vmul.f32 %v543_v61, %v543_v61  ;;  %v548_v18 = vsel %vm377_vm3, %v543_v61, 0.0 }
 0x174   :  { %v450_v62 = vpop.permute.xlu0 %449  ;;  %v452_v63 = vpop.permute.xlu1 %451  ;;  %v608_v50 = vrot.slane %v607_v34, 2  ;;  %v519_v54 = vadd.f32 %v518_v38, %v517_v24  ;;  %v537_v60 = vadd.f32 %v536_v47, %v535_v31  ;;  %v621_v5 = vadd.f32 %v620_v57, %v619_v39  ;;  %v629_v39 = vld [vmem:[%s1014_s3] sm:$0x1]  ;;  %s840_s3 = smov [#allocation7]  }
 0x175   :  { %v455_v1 = vadd.f32 %v450_v62, %v447_v51  ;;  %v456_v2 = vadd.f32 %v452_v63, %v448_v55  ;;  %v563_v16 = vsel %vm377_vm3, %v559_v0, 0.0  ;;  %v566_v26 = vsel %vm377_vm3, %v561_v11, 0.0  ;;  %v643_v47 = vld [vmem:[#allocation7 + $0x16] sm:$0x3] }
 0x176   :  { %v542_v6 = vld [vmem:[#allocation7 + $0xa] sm:$0x1]  ;;  %v544_v7 = vld [vmem:[#allocation7 + $0xe] sm:$0x1]  ;;  %v609_v63 = vadd.f32 %v608_v50, %v607_v34 }
 0x177   :  { %v546_v12 = vsel %vm377_vm3, %v542_v6, 0.0  ;;  %v560_v13 = vmul.f32 %v542_v6, %v542_v6  ;;  %457 = vst.msk [vmem:[#allocation7 + $0x11] sm:$0x1] %vm377_vm3, %v455_v1  ;;  %458 = vst.msk [vmem:[#allocation7 + $0x15] sm:$0x1] %vm377_vm3, %v456_v2  ;;  %v562_v20 = vmul.f32 %v544_v7, %v544_v7  ;;  %v550_v28 = vsel %vm377_vm3, %v544_v7, 0.0 }
 0x178   :  { %v547_v15 = vadd.f32 %v546_v12, %v545_v8  ;;  %v520_v2 = vrot.slane %v519_v54, 1  ;;  %v538_v7 = vrot.slane %v537_v60, 1  ;;  %v637_v50 = vld [vmem:[#allocation7 + $0xa] sm:$0x3]  ;;  %v639_v57 = vld [vmem:[#allocation7 + $0xe] sm:$0x3] }
 0x179   :  { %v564_v19 = vsel %vm377_vm3, %v560_v13, 0.0  ;;  %v568_v32 = vsel %vm377_vm3, %v562_v20, 0.0  ;;  %v610_v13 = vrot.slane %v609_v63, 1 }
 0x17a   :  { %v565_v22 = vadd.f32 %v564_v19, %v563_v16  ;;  %v549_v23 = vadd.f32 %v548_v18, %v547_v15  ;;  %v521_v14 = vadd.f32 %v520_v2, %v519_v54  ;;  %v622_v19 = vrot.slane %v621_v5, 1 }
 0x17b   :  { %v539_v20 = vadd.f32 %v538_v7, %v537_v60  ;;  %v611_v24 = vadd.f32 %v610_v13, %v609_v63  ;;  %v644_v63 = vld [vmem:[#allocation7 + $0x18] sm:$0x3] }
 0x17c   :  { %v551_v29 = vadd.f32 %v550_v28, %v549_v23  ;;  %v567_v30 = vadd.f32 %v566_v26, %v565_v22 }
 0x17e   :  { %v552_v35 = vrot.slane %v551_v29, 4  ;;  %v569_v36 = vadd.f32 %v568_v32, %v567_v30  ;;  %v577_v37 = vld [vmem:[#allocation7 + $0x10] sm:$0x3]  ;;  %v578_v42 = vld [vmem:[#allocation7 + $0x14] sm:$0x3] }
 0x17f   :  { %v579_v40 = vsel %vm54_vm2, %v577_v37, 0.0  ;;  %v589_v41 = vmul.f32 %v577_v37, %v577_v37  ;;  %v580_v45 = vsel %vm54_vm2, %v578_v42, 0.0  ;;  %v590_v46 = vmul.f32 %v578_v42, %v578_v42  ;;  %v633_v42 = vld [vmem:[%s1015_s4] sm:$0x1]  ;;  %s729_s4 = sshll.u32 %s840_s3, 4  ;;  %s730_s4 = int_to_ptr.vmem [resolvable:$true] %s729_s4 }
 0x180   :  { %v553_v43 = vadd.f32 %v552_v35, %v551_v29  ;;  %v570_v44 = vrot.slane %v569_v36, 4  ;;  %v581_v49 = vadd.f32 %v580_v45, %v579_v40  ;;  %v623_v29 = vadd.f32 %v622_v19, %v621_v5  ;;  %v641_v45 = vld [vmem:[#allocation7 + $0x12] sm:$0x3]  ;;  %s806_s9 = scalar_lea.vmem %s730_s4, 512  ;;  %p811_p11 = scmp.lt.s32.totalorder %s730_s4, %s730_s4 }
 0x181   :  { %v591_v48 = vsel %vm54_vm2, %v589_v41, 0.0  ;;  %v592_v53 = vsel %vm54_vm2, %v590_v46, 0.0  ;;  %v642_v46 = vld [vmem:[#allocation7 + $0x14] sm:$0x3]  ;;  %p807_p10 = scmp.ne.s32.totalorder %s730_s4, %s806_s9  ;;  %p812_p12 = scmp.lt.s32.totalorder %s806_s9, %s806_s9 }
 0x182   :  { %v554_v51 = vrot.slane %v553_v43, 2  ;;  %v571_v52 = vadd.f32 %v570_v44, %v569_v36  ;;  %v582_v55 = vrot.slane %v581_v49, 4  ;;  %v593_v56 = vadd.f32 %v592_v53, %v591_v48  ;;  %v645_v48 = vld [vmem:[#allocation7 + $0x1a] sm:$0x3]  ;;  %v647_v53 = vld [vmem:[#allocation7 + $0x1e] sm:$0x3] }
 0x183   :  { %p813_p13 = por %p812_p12, %p811_p11 }
 0x184   :  { %v555_v58 = vadd.f32 %v554_v51, %v553_v43  ;;  %v572_v59 = vrot.slane %v571_v52, 2  ;;  %v583_v61 = vadd.f32 %v582_v55, %v581_v49  ;;  %v594_v62 = vrot.slane %v593_v56, 4  ;;  %v636_v49 = vld [vmem:[#allocation7 + $0x8] sm:$0x3] }
 0x185   :  { %p814_p0 = pnand %p813_p13, %p807_p10 }
 0x186   :  { %v556_v0 = vrot.slane %v555_v58, 1  ;;  %v573_v1 = vadd.f32 %v572_v59, %v571_v52  ;;  %v584_v3 = vrot.slane %v583_v61, 2  ;;  %v595_v4 = vadd.f32 %v594_v62, %v593_v56  ;;  %v638_v56 = vld [vmem:[#allocation7 + $0xc] sm:$0x3] }
 0x188   :  { %v574_v6 = vrot.slane %v573_v1, 1  ;;  %v557_v8 = vadd.f32 %v556_v0, %v555_v58  ;;  %v585_v11 = vadd.f32 %v584_v3, %v583_v61  ;;  %v596_v12 = vrot.slane %v595_v4, 2  ;;  %v640_v58 = vld [vmem:[#allocation7 + $0x10] sm:$0x3] }
 0x18a   :  { %v575_v15 = vadd.f32 %v574_v6, %v573_v1  ;;  %v586_v16 = vrot.slane %v585_v11, 1  ;;  %v597_v18 = vadd.f32 %v596_v12, %v595_v4  ;;  %v558_v21 = vadd.f32 %v557_v8, %v521_v14  ;;  %v646_v4 = vld [vmem:[#allocation7 + $0x1c] sm:$0x3] }
 0x18c   :  { %v587_v22 = vadd.f32 %v586_v16, %v585_v11  ;;  %v598_v23 = vrot.slane %v597_v18, 1  ;;  %v576_v25 = vadd.f32 %v575_v15, %v539_v20 }
 0x18e   :  { %v588_v26 = vadd.f32 %v587_v22, %v558_v21  ;;  %v599_v28 = vadd.f32 %v598_v23, %v597_v18 }
 0x190   :  { %v600_v30 = vadd.f32 %v599_v28, %v576_v25  ;;  %v612_v31 = vadd.f32 %v611_v24, %v588_v26 }
 0x192   :  { %v624_v32 = vadd.f32 %v623_v29, %v600_v30  ;;  %v625_v34 = vmul.f32 0.055555556, %v612_v31 }
 0x194   :  { %v626_v35 = vmul.f32 0.055555556, %v624_v32  ;;  %v627_v36 = vmul.f32 %v625_v34, %v625_v34 }
 0x196   :  { %v628_v37 = vsub.f32 %v626_v35, %v627_v36 }
 0x198   :  { %v630_v38 = vadd.f32 1e-05, %v628_v37 }
 0x19a   :  { %764 = vrsqrt.f32 %v630_v38 }
 0x1a7   :  { %v765_v40 = vpop.eup %764 }
 0x1a8   :  { %v632_v41 = vmul.f32 %v765_v40, %v629_v39 }
 0x1aa   :  { %v634_v43 = vmul.f32 %v632_v41, %v625_v34  ;;  %v652_v44 = vrot.slane %v632_v41, %v903_v33 }
 0x1ac   :  { %v635_v51 = vsub.f32 %v633_v42, %v634_v43  ;;  %v664_v52 = vmul.f32 %v652_v44, %v642_v46  ;;  %v654_v54 = vmul.f32 %v652_v44, %v930_v10  ;;  %v655_v55 = vmul.f32 %v652_v44, %v928_v9 }
 0x1ad   :  { %v656_v59 = vmul.f32 %v652_v44, %v940_v17  ;;  %v657_v60 = vmul.f32 %v652_v44, %v944_v27  ;;  %v658_v61 = vmul.f32 %v652_v44, %v636_v49  ;;  %v659_v62 = vmul.f32 %v652_v44, %v637_v50 }
 0x1ae   :  { %v674_v0 = vrot.slane %v635_v51, %v903_v33  ;;  %v660_v1 = vmul.f32 %v652_v44, %v638_v56  ;;  %v661_v2 = vmul.f32 %v652_v44, %v639_v57  ;;  %v662_v3 = vmul.f32 %v652_v44, %v640_v58 }
 0x1af   :  { %v663_v5 = vmul.f32 %v652_v44, %v641_v45  ;;  %v665_v10 = vmul.f32 %v652_v44, %v643_v47  ;;  %v666_v6 = vmul.f32 %v652_v44, %v644_v63  ;;  %v667_v9 = vmul.f32 %v652_v44, %v645_v48 }
 0x1b0   :  { %v686_v7 = vadd.f32 %v674_v0, %v664_v52  ;;  %v668_v8 = vmul.f32 %v652_v44, %v646_v4  ;;  %v669_v11 = vmul.f32 %v652_v44, %v647_v53  ;;  %v676_v12 = vadd.f32 %v674_v0, %v654_v54 }
 0x1b1   :  { %v677_v17 = vadd.f32 %v674_v0, %v655_v55  ;;  %v678_v13 = vadd.f32 %v674_v0, %v656_v59  ;;  %v679_v27 = vadd.f32 %v674_v0, %v657_v60  ;;  %v680_v14 = vadd.f32 %v674_v0, %v658_v61 }
 0x1b2   :  { %v702_v15 = vmax.f32 %v686_v7, 0.0  ;;  %v681_v16 = vadd.f32 %v674_v0, %v659_v62  ;;  %v682_v18 = vadd.f32 %v674_v0, %v660_v1  ;;  %v683_v33 = vadd.f32 %v674_v0, %v661_v2 }
 0x1b3   :  { %v684_v19 = vadd.f32 %v674_v0, %v662_v3  ;;  %v685_v20 = vadd.f32 %v674_v0, %v663_v5  ;;  %v687_v21 = vadd.f32 %v674_v0, %v665_v10  ;;  %v688_v22 = vadd.f32 %v674_v0, %v666_v6 }
 0x1b4   :  { %718 = vst.msk [vmem:[#allocation7 + $0x14] sm:$0x3] %vm54_vm2, %v702_v15  ;;  %v689_v23 = vadd.f32 %v674_v0, %v667_v9  ;;  %v690_v24 = vadd.f32 %v674_v0, %v668_v8  ;;  %v691_v25 = vadd.f32 %v674_v0, %v669_v11  ;;  %v692_v26 = vmax.f32 %v676_v12, 0.0 }
 0x1b5   :  { %v693_v28 = vmax.f32 %v677_v17, 0.0  ;;  %v694_v29 = vmax.f32 %v678_v13, 0.0  ;;  %v695_v30 = vmax.f32 %v679_v27, 0.0  ;;  %v696_v31 = vmax.f32 %v680_v14, 0.0 }
 0x1b6   :  { %v697_v32 = vmax.f32 %v681_v16, 0.0  ;;  %v698_v34 = vmax.f32 %v682_v18, 0.0  ;;  %v699_v35 = vmax.f32 %v683_v33, 0.0  ;;  %v700_v36 = vmax.f32 %v684_v19, 0.0  ;;  %708 = vst.msk [vmem:[#allocation7] sm:$0x3] %vm54_vm2, %v692_v26 }
 0x1b7   :  { %v701_v37 = vmax.f32 %v685_v20, 0.0  ;;  %v703_v38 = vmax.f32 %v687_v21, 0.0  ;;  %v704_v39 = vmax.f32 %v688_v22, 0.0  ;;  %v705_v40 = vmax.f32 %v689_v23, 0.0  ;;  %709 = vst.msk [vmem:[#allocation7 + $0x2] sm:$0x3] %vm54_vm2, %v693_v28 }
 0x1b8   :  { %710 = vst.msk [vmem:[#allocation7 + $0x4] sm:$0x3] %vm54_vm2, %v694_v29  ;;  %711 = vst.msk [vmem:[#allocation7 + $0x6] sm:$0x3] %vm54_vm2, %v695_v30  ;;  %v706_v41 = vmax.f32 %v690_v24, 0.0  ;;  %v707_v42 = vmax.f32 %v691_v25, 0.0 }
 0x1b9   :  { %712 = vst.msk [vmem:[#allocation7 + $0x8] sm:$0x3] %vm54_vm2, %v696_v31  ;;  %713 = vst.msk [vmem:[#allocation7 + $0xa] sm:$0x3] %vm54_vm2, %v697_v32 }
 0x1ba   :  { %714 = vst.msk [vmem:[#allocation7 + $0xc] sm:$0x3] %vm54_vm2, %v698_v34  ;;  %715 = vst.msk [vmem:[#allocation7 + $0xe] sm:$0x3] %vm54_vm2, %v699_v35 }
 0x1bb   :  { %716 = vst.msk [vmem:[#allocation7 + $0x10] sm:$0x3] %vm54_vm2, %v700_v36  ;;  %717 = vst.msk [vmem:[#allocation7 + $0x12] sm:$0x3] %vm54_vm2, %v701_v37 }
 0x1bc   :  { %719 = vst.msk [vmem:[#allocation7 + $0x16] sm:$0x3] %vm54_vm2, %v703_v38  ;;  %720 = vst.msk [vmem:[#allocation7 + $0x18] sm:$0x3] %vm54_vm2, %v704_v39 }
 0x1bd   :  { %721 = vst.msk [vmem:[#allocation7 + $0x1a] sm:$0x3] %vm54_vm2, %v705_v40  ;;  %722 = vst.msk [vmem:[#allocation7 + $0x1c] sm:$0x3] %vm54_vm2, %v706_v41 }
 0x1be   :  { %723 = vst.msk [vmem:[#allocation7 + $0x1e] sm:$0x3] %vm54_vm2, %v707_v42 }
 0x1bf   :  { %817 = shalt.err (!%p814_p0)
}
 0x1c0   :  { %s841_s10 = smov 32   ;;  %s842_s11 = smov 2  }
 0x1c1   :  { %735 = dma.vmem_to_hbm [thread:$0]  %s730_s4, 512, %s1016_s5, [#allocation4], %s841_s10, %s841_s10, %s842_s11  }
 0x1c2   :  { %830 = dma.done.wait [#allocation4], 512  }
 0x1c3   :  { %831 = vsyncadd [#allocation4], 4294966784 }
 0x1c4   :  { %739 = vsyncpa [#allocation3], 1 }
 0x1c5   :  { %740 = vsyncpa [#allocation6], 1 }
 0x1c6   :  { %741 = vsyncpa [#allocation4], 1 }

</bundles_post_ra>
